<compile_context>
chip_gen: v7x
topology: tpu7x:2x2x1
jax: 0.10.0
libtpu: 0.0.40
codegen_flags: <defaults>
</compile_context>

<pallas_src>
import jax
import jax.numpy as jnp
from jax.experimental import pallas as pl
from jax.experimental.pallas import tpu as pltpu


def _round_up(x, m):
    return ((x + m - 1) // m) * m


def _pick_tile_b(B, cap=512):
    # >=2 grid steps when possible (v7x megacore), <=cap rows per step
    # (amortizes ~0.35us/step pipeline overhead), multiple of 16 rows.
    t = _round_up(pl.cdiv(B, 2), 16)
    return max(16, min(cap, t))


def _critic_kernel(s_ref, a_ref, w1s_ref, w1a_ref, b1_ref, g_ref, beta_ref,
                   w2_ref, b2_ref, w3_ref, b3_ref, out_ref):
    cdt = w1s_ref.dtype  # matmul compute dtype (bf16 by default, f32 optional)

    # ---- Linear 1 with fused concat: x @ W1 == s @ W1[:sd] + a @ W1[sd:] ----
    # (inputs arrive f32 from HBM; cast to the MXU dtype here, in-kernel)
    h = (jnp.dot(s_ref[...].astype(cdt), w1s_ref[...],
                 preferred_element_type=jnp.float32)
         + jnp.dot(a_ref[...].astype(cdt), w1a_ref[...],
                   preferred_element_type=jnp.float32)
         + b1_ref[...])

    # ---- LayerNorm over the hidden axis (f32, gamma folded into inv-std) ----
    mean = jnp.mean(h, axis=-1, keepdims=True)
    centered = h - mean
    var = jnp.mean(centered * centered, axis=-1, keepdims=True)
    h = centered * (g_ref[...] * jax.lax.rsqrt(var + 1e-5)) + beta_ref[...]

    # ---- ReLU ----
    h = jnp.maximum(h, 0.0)

    # ---- Linear 2 + ReLU (f32 accumulate) ----
    h = jnp.dot(h.astype(cdt), w2_ref[...],
                preferred_element_type=jnp.float32) + b2_ref[...]
    h = jnp.maximum(h, 0.0)

    # ---- Linear 3 -> narrow [tile_b, n_agents] output (masked store) ----
    q = jnp.dot(h.astype(cdt), w3_ref[...],
                preferred_element_type=jnp.float32) + b3_ref[...]
    out_ref[...] = q.astype(out_ref.dtype)


def prepare_params(params, state_dim, dtype=jnp.bfloat16):
    """One-time weight prep: split W1 for the fused concat, cast matmul
    operands to the MXU dtype, keep LN/bias params in f32.  Call once and
    reuse across forward calls (avoids per-call XLA cast/split ops)."""
    w1, b1, gamma, beta, w2, b2, w3, b3 = params
    f32 = jnp.float32
    return (
        w1[:state_dim, :].astype(dtype),   # W1 rows for `state`
        w1[state_dim:, :].astype(dtype),   # W1 rows for `joint_action`
        b1.reshape(1, -1).astype(f32),
        gamma.reshape(1, -1).astype(f32),
        beta.reshape(1, -1).astype(f32),
        w2.astype(dtype),
        b2.reshape(1, -1).astype(f32),
        w3.astype(dtype),
        b3.reshape(1, -1).astype(f32),
    )


def shared_critic_forward(state, joint_action, prepped_params, tile_b_cap=512):
    """Pallas implementation of SharedCritic.forward.

    state:          [B, state_dim]        float32
    joint_action:   [B, n_agents*act_dim] float32
    prepped_params: output of prepare_params(...)
    returns:        [B, n_agents]         float32
    """
    w1s, w1a, b1, gamma, beta, w2, b2, w3, b3 = prepped_params
    B, state_dim = state.shape
    act_dim_total = joint_action.shape[1]
    hidden = w1s.shape[1]
    n_agents = w3.shape[1]

    tb = _pick_tile_b(B, tile_b_cap)
    grid = (pl.cdiv(B, tb),)   # ragged last block handled by Pallas (no pad)

    def batch_spec(cols):
        return pl.BlockSpec((tb, cols), lambda i: (i, 0))

    def resident_spec(shape):
        # Constant block index -> weights stay VMEM-resident across the grid.
        return pl.BlockSpec(shape, lambda i: (0, 0))

    return pl.pallas_call(
        _critic_kernel,
        out_shape=jax.ShapeDtypeStruct((B, n_agents), jnp.float32),
        grid=grid,
        in_specs=[
            batch_spec(state_dim),                   # state tile       (f32)
            batch_spec(act_dim_total),               # joint_action tile(f32)
            resident_spec((state_dim, hidden)),      # W1[:state_dim]
            resident_spec((act_dim_total, hidden)),  # W1[state_dim:]
            resident_spec((1, hidden)),              # b1
            resident_spec((1, hidden)),              # LN gamma
            resident_spec((1, hidden)),              # LN beta
            resident_spec((hidden, hidden)),         # W2
            resident_spec((1, hidden)),              # b2
            resident_spec((hidden, n_agents)),       # W3 (narrow, no pad)
            resident_spec((1, n_agents)),            # b3
        ],
        out_specs=pl.BlockSpec((tb, n_agents), lambda i: (i, 0)),
        compiler_params=pltpu.CompilerParams(
            dimension_semantics=("parallel",),
            vmem_limit_bytes=32 * 1024 * 1024,
        ),
    )(state, joint_action, w1s, w1a, b1, gamma, beta, w2, b2, w3, b3)


def init_params(key, state_dim, action_dim, n_agents, hidden_dim=None):
    """Deterministic parameter init mirroring SharedCritic.__init__/_init_weights.

    Linear weights: Kaiming-uniform (fan_in, relu gain sqrt(2)); biases zero.
    LayerNorm: gamma=1, beta=0.  Weights stored [in, out] (y = x @ W + b).
    """
    input_dim = state_dim + n_agents * action_dim
    if hidden_dim is None:
        hidden_dim = max(128, input_dim)

    def kaiming_uniform(k, fan_in, fan_out):
        bound = jnp.sqrt(6.0 / fan_in)  # gain sqrt(2) * sqrt(3/fan_in)
        return jax.random.uniform(k, (fan_in, fan_out), jnp.float32, -bound, bound)

    k1, k2, k3 = jax.random.split(key, 3)
    w1 = kaiming_uniform(k1, input_dim, hidden_dim)
    b1 = jnp.zeros((1, hidden_dim), jnp.float32)
    gamma = jnp.ones((1, hidden_dim), jnp.float32)
    beta = jnp.zeros((1, hidden_dim), jnp.float32)
    w2 = kaiming_uniform(k2, hidden_dim, hidden_dim)
    b2 = jnp.zeros((1, hidden_dim), jnp.float32)
    w3 = kaiming_uniform(k3, hidden_dim, n_agents)
    b3 = jnp.zeros((1, n_agents), jnp.float32)
    return (w1, b1, gamma, beta, w2, b2, w3, b3), input_dim, hidden_dim


def reference_forward(state, joint_action, params, compute_dtype=jnp.bfloat16):
    """Pure-JAX reference with matching matmul-dtype / f32-accumulate semantics."""
    w1, b1, gamma, beta, w2, b2, w3, b3 = params
    cd = compute_dtype
    x = jnp.concatenate([state, joint_action], axis=-1)
    h = jnp.dot(x.astype(cd), w1.astype(cd),
                preferred_element_type=jnp.float32) + b1
    mean = jnp.mean(h, axis=-1, keepdims=True)
    c = h - mean
    var = jnp.mean(c * c, axis=-1, keepdims=True)
    h = c * (gamma * jax.lax.rsqrt(var + 1e-5)) + beta
    h = jnp.maximum(h, 0.0)
    h = jnp.maximum(jnp.dot(h.astype(cd), w2.astype(cd),
                            preferred_element_type=jnp.float32) + b2, 0.0)
    return jnp.dot(h.astype(cd), w3.astype(cd),
                   preferred_element_type=jnp.float32) + b3


if __name__ == "__main__":
    # Small shapes consistent with the module: input_dim = 16 + 4*4 = 32,
    # hidden_dim = max(128, 32) = 128.
    state_dim = 16
    action_dim = 4
    n_agents = 4

    key = jax.random.PRNGKey(0)
    kp, ks, ka = jax.random.split(key, 3)
    params, input_dim, hidden_dim = init_params(kp, state_dim, action_dim, n_agents)
    prepped = prepare_params(params, state_dim)   # one-time weight prep

    # Case 1: tiny batch (single ragged block, grid=1).
    B1 = 10
    s1 = jax.random.normal(ks, (B1, state_dim), jnp.float32)
    a1 = jax.random.normal(ka, (B1, n_agents * action_dim), jnp.float32)
    q1 = jax.block_until_ready(shared_critic_forward(s1, a1, prepped))
    q1_ref = reference_forward(s1, a1, params)
    assert q1.shape == (B1, n_agents)
    assert jnp.allclose(q1, q1_ref, atol=5e-3, rtol=5e-3), "mismatch vs reference (B=10)"

    # Case 2: larger batch -> 2 grid steps (v7x megacore path) + ragged tail.
    B2 = 300
    ks2, ka2 = jax.random.split(jax.random.PRNGKey(1))
    s2 = jax.random.normal(ks2, (B2, state_dim), jnp.float32)
    a2 = jax.random.normal(ka2, (B2, n_agents * action_dim), jnp.float32)
    q2 = jax.block_until_ready(shared_critic_forward(s2, a2, prepped))
    q2_ref = reference_forward(s2, a2, params)
    assert q2.shape == (B2, n_agents)
    assert jnp.allclose(q2, q2_ref, atol=5e-3, rtol=5e-3), "mismatch vs reference (B=300)"

    print("KERNEL_OK")
</pallas_src>

<mosaic_0001>
module attributes {stable_mosaic.version = 11 : i64} {
  func.func @_critic_kernel(%arg0: i32, %arg1: memref<16x16xf32, #tpu.memory_space<vmem>>, %arg2: memref<16x16xf32, #tpu.memory_space<vmem>>, %arg3: memref<16x128xbf16, #tpu.memory_space<vmem>>, %arg4: memref<16x128xbf16, #tpu.memory_space<vmem>>, %arg5: memref<1x128xf32, #tpu.memory_space<vmem>>, %arg6: memref<1x128xf32, #tpu.memory_space<vmem>>, %arg7: memref<1x128xf32, #tpu.memory_space<vmem>>, %arg8: memref<128x128xbf16, #tpu.memory_space<vmem>>, %arg9: memref<1x128xf32, #tpu.memory_space<vmem>>, %arg10: memref<128x4xbf16, #tpu.memory_space<vmem>>, %arg11: memref<1x4xf32, #tpu.memory_space<vmem>>, %arg12: memref<16x4xf32, #tpu.memory_space<vmem>>) attributes {dimension_semantics = [#tpu.dimension_semantics<parallel>], iteration_bounds = array<i64: 1>, scalar_prefetch = 0 : i64, scratch_operands = 0 : i64, tpu.core_type = #tpu.core_type<tc>, window_params = [{transform_indices = @transform_0, window_bounds = array<i64: 16, 16>}, {transform_indices = @transform_1, window_bounds = array<i64: 16, 16>}, {pipeline_mode = #tpu.pipeline_mode<synchronous>, transform_indices = @transform_2, window_bounds = array<i64: 16, 128>}, {pipeline_mode = #tpu.pipeline_mode<synchronous>, transform_indices = @transform_3, window_bounds = array<i64: 16, 128>}, {pipeline_mode = #tpu.pipeline_mode<synchronous>, transform_indices = @transform_4, window_bounds = array<i64: 1, 128>}, {pipeline_mode = #tpu.pipeline_mode<synchronous>, transform_indices = @transform_5, window_bounds = array<i64: 1, 128>}, {pipeline_mode = #tpu.pipeline_mode<synchronous>, transform_indices = @transform_6, window_bounds = array<i64: 1, 128>}, {pipeline_mode = #tpu.pipeline_mode<synchronous>, transform_indices = @transform_7, window_bounds = array<i64: 128, 128>}, {pipeline_mode = #tpu.pipeline_mode<synchronous>, transform_indices = @transform_8, window_bounds = array<i64: 1, 128>}, {pipeline_mode = #tpu.pipeline_mode<synchronous>, transform_indices = @transform_9, window_bounds = array<i64: 128, 4>}, {pipeline_mode = #tpu.pipeline_mode<synchronous>, transform_indices = @transform_10, window_bounds = array<i64: 1, 4>}, {transform_indices = @transform_11, window_bounds = array<i64: 16, 4>}]} {
    %c0 = arith.constant 0 : index
    %c0_0 = arith.constant 0 : index
    %0 = vector.load %arg1[%c0, %c0_0] : memref<16x16xf32, #tpu.memory_space<vmem>>, vector<16x16xf32>
    %1 = arith.truncf %0 : vector<16x16xf32> to vector<16x16xbf16>
    %c0_1 = arith.constant 0 : index
    %c0_2 = arith.constant 0 : index
    %2 = vector.load %arg3[%c0_1, %c0_2] : memref<16x128xbf16, #tpu.memory_space<vmem>>, vector<16x128xbf16>
    %cst = arith.constant dense<0.000000e+00> : vector<16x128xf32>
    %3 = tpu.matmul %1, %2, %cst {dimension_numbers = #tpu.dot_dimension_numbers<[1], [0], [0], [1], [0, 0, 1, 1], [], []>} : vector<16x16xbf16>, vector<16x128xbf16>, vector<16x128xf32> -> vector<16x128xf32>
    %c0_3 = arith.constant 0 : index
    %c0_4 = arith.constant 0 : index
    %4 = vector.load %arg2[%c0_3, %c0_4] : memref<16x16xf32, #tpu.memory_space<vmem>>, vector<16x16xf32>
    %5 = arith.truncf %4 : vector<16x16xf32> to vector<16x16xbf16>
    %c0_5 = arith.constant 0 : index
    %c0_6 = arith.constant 0 : index
    %6 = vector.load %arg4[%c0_5, %c0_6] : memref<16x128xbf16, #tpu.memory_space<vmem>>, vector<16x128xbf16>
    %cst_7 = arith.constant dense<0.000000e+00> : vector<16x128xf32>
    %7 = tpu.matmul %5, %6, %cst_7 {dimension_numbers = #tpu.dot_dimension_numbers<[1], [0], [0], [1], [0, 0, 1, 1], [], []>} : vector<16x16xbf16>, vector<16x128xbf16>, vector<16x128xf32> -> vector<16x128xf32>
    %8 = arith.addf %3, %7 : vector<16x128xf32>
    %c0_8 = arith.constant 0 : index
    %c0_9 = arith.constant 0 : index
    %9 = vector.load %arg5[%c0_8, %c0_9] : memref<1x128xf32, #tpu.memory_space<vmem>>, vector<1x128xf32>
    %10 = vector.broadcast %9 : vector<1x128xf32> to vector<16x128xf32>
    %11 = arith.addf %8, %10 : vector<16x128xf32>
    %cst_10 = arith.constant dense<0.000000e+00> : vector<16xf32>
    %12 = vector.multi_reduction <add>, %11, %cst_10 [1] : vector<16x128xf32> to vector<16xf32>
    %13 = vector.shape_cast %12 : vector<16xf32> to vector<16x1xf32>
    %cst_11 = arith.constant 1.280000e+02 : f32
    %14 = vector.broadcast %cst_11 : f32 to vector<16x1xf32>
    %15 = arith.divf %13, %14 : vector<16x1xf32>
    %16 = vector.broadcast %15 : vector<16x1xf32> to vector<16x128xf32>
    %17 = arith.subf %11, %16 : vector<16x128xf32>
    %18 = arith.mulf %17, %17 : vector<16x128xf32>
    %cst_12 = arith.constant dense<0.000000e+00> : vector<16xf32>
    %19 = vector.multi_reduction <add>, %18, %cst_12 [1] : vector<16x128xf32> to vector<16xf32>
    %20 = vector.shape_cast %19 : vector<16xf32> to vector<16x1xf32>
    %cst_13 = arith.constant 1.280000e+02 : f32
    %21 = vector.broadcast %cst_13 : f32 to vector<16x1xf32>
    %22 = arith.divf %20, %21 : vector<16x1xf32>
    %c0_14 = arith.constant 0 : index
    %c0_15 = arith.constant 0 : index
    %23 = vector.load %arg6[%c0_14, %c0_15] : memref<1x128xf32, #tpu.memory_space<vmem>>, vector<1x128xf32>
    %cst_16 = arith.constant 9.99999974E-6 : f32
    %24 = vector.broadcast %cst_16 : f32 to vector<16x1xf32>
    %25 = arith.addf %22, %24 : vector<16x1xf32>
    %26 = math.rsqrt %25 : vector<16x1xf32>
    %27 = vector.broadcast %23 : vector<1x128xf32> to vector<16x128xf32>
    %28 = vector.broadcast %26 : vector<16x1xf32> to vector<16x128xf32>
    %29 = arith.mulf %27, %28 : vector<16x128xf32>
    %30 = arith.mulf %17, %29 : vector<16x128xf32>
    %c0_17 = arith.constant 0 : index
    %c0_18 = arith.constant 0 : index
    %31 = vector.load %arg7[%c0_17, %c0_18] : memref<1x128xf32, #tpu.memory_space<vmem>>, vector<1x128xf32>
    %32 = vector.broadcast %31 : vector<1x128xf32> to vector<16x128xf32>
    %33 = arith.addf %30, %32 : vector<16x128xf32>
    %cst_19 = arith.constant 0.000000e+00 : f32
    %34 = vector.broadcast %cst_19 : f32 to vector<16x128xf32>
    %35 = arith.maximumf %33, %34 : vector<16x128xf32>
    %36 = arith.truncf %35 : vector<16x128xf32> to vector<16x128xbf16>
    %c0_20 = arith.constant 0 : index
    %c0_21 = arith.constant 0 : index
    %37 = vector.load %arg8[%c0_20, %c0_21] : memref<128x128xbf16, #tpu.memory_space<vmem>>, vector<128x128xbf16>
    %cst_22 = arith.constant dense<0.000000e+00> : vector<16x128xf32>
    %38 = tpu.matmul %36, %37, %cst_22 {dimension_numbers = #tpu.dot_dimension_numbers<[1], [0], [0], [1], [0, 0, 1, 1], [], []>} : vector<16x128xbf16>, vector<128x128xbf16>, vector<16x128xf32> -> vector<16x128xf32>
    %c0_23 = arith.constant 0 : index
    %c0_24 = arith.constant 0 : index
    %39 = vector.load %arg9[%c0_23, %c0_24] : memref<1x128xf32, #tpu.memory_space<vmem>>, vector<1x128xf32>
    %40 = vector.broadcast %39 : vector<1x128xf32> to vector<16x128xf32>
    %41 = arith.addf %38, %40 : vector<16x128xf32>
    %cst_25 = arith.constant 0.000000e+00 : f32
    %42 = vector.broadcast %cst_25 : f32 to vector<16x128xf32>
    %43 = arith.maximumf %41, %42 : vector<16x128xf32>
    %44 = arith.truncf %43 : vector<16x128xf32> to vector<16x128xbf16>
    %c0_26 = arith.constant 0 : index
    %c0_27 = arith.constant 0 : index
    %45 = vector.load %arg10[%c0_26, %c0_27] : memref<128x4xbf16, #tpu.memory_space<vmem>>, vector<128x4xbf16>
    %cst_28 = arith.constant dense<0.000000e+00> : vector<16x4xf32>
    %46 = tpu.matmul %44, %45, %cst_28 {dimension_numbers = #tpu.dot_dimension_numbers<[1], [0], [0], [1], [0, 0, 1, 1], [], []>} : vector<16x128xbf16>, vector<128x4xbf16>, vector<16x4xf32> -> vector<16x4xf32>
    %c0_29 = arith.constant 0 : index
    %c0_30 = arith.constant 0 : index
    %47 = vector.load %arg11[%c0_29, %c0_30] : memref<1x4xf32, #tpu.memory_space<vmem>>, vector<1x4xf32>
    %48 = vector.broadcast %47 : vector<1x4xf32> to vector<16x4xf32>
    %49 = arith.addf %46, %48 : vector<16x4xf32>
    %c0_31 = arith.constant 0 : index
    %c0_32 = arith.constant 0 : index
    %50 = vector.load %arg12[%c0_31, %c0_32] : memref<16x4xf32, #tpu.memory_space<vmem>>, vector<16x4xf32>
    tpu.vector_store %arg12[%c0_31, %c0_32], %49 {strides = array<i32>} : memref<16x4xf32, #tpu.memory_space<vmem>>, vector<16x4xf32>,
    return
  }
  func.func @transform_0(%arg0: i32) -> (i32, i32) {
    %c0_i32 = arith.constant 0 : i32
    %c0_i32_0 = arith.constant 0 : i32
    return %arg0, %c0_i32 : i32, i32
  }
  func.func @transform_1(%arg0: i32) -> (i32, i32) {
    %c0_i32 = arith.constant 0 : i32
    %c0_i32_0 = arith.constant 0 : i32
    return %arg0, %c0_i32 : i32, i32
  }
  func.func @transform_2(%arg0: i32) -> (i32, i32) {
    %c0_i32 = arith.constant 0 : i32
    %c0_i32_0 = arith.constant 0 : i32
    %c0_i32_1 = arith.constant 0 : i32
    return %c0_i32, %c0_i32_0 : i32, i32
  }
  func.func @transform_3(%arg0: i32) -> (i32, i32) {
    %c0_i32 = arith.constant 0 : i32
    %c0_i32_0 = arith.constant 0 : i32
    %c0_i32_1 = arith.constant 0 : i32
    return %c0_i32, %c0_i32_0 : i32, i32
  }
  func.func @transform_4(%arg0: i32) -> (i32, i32) {
    %c0_i32 = arith.constant 0 : i32
    %c0_i32_0 = arith.constant 0 : i32
    %c0_i32_1 = arith.constant 0 : i32
    return %c0_i32, %c0_i32_0 : i32, i32
  }
  func.func @transform_5(%arg0: i32) -> (i32, i32) {
    %c0_i32 = arith.constant 0 : i32
    %c0_i32_0 = arith.constant 0 : i32
    %c0_i32_1 = arith.constant 0 : i32
    return %c0_i32, %c0_i32_0 : i32, i32
  }
  func.func @transform_6(%arg0: i32) -> (i32, i32) {
    %c0_i32 = arith.constant 0 : i32
    %c0_i32_0 = arith.constant 0 : i32
    %c0_i32_1 = arith.constant 0 : i32
    return %c0_i32, %c0_i32_0 : i32, i32
  }
  func.func @transform_7(%arg0: i32) -> (i32, i32) {
    %c0_i32 = arith.constant 0 : i32
    %c0_i32_0 = arith.constant 0 : i32
    %c0_i32_1 = arith.constant 0 : i32
    return %c0_i32, %c0_i32_0 : i32, i32
  }
  func.func @transform_8(%arg0: i32) -> (i32, i32) {
    %c0_i32 = arith.constant 0 : i32
    %c0_i32_0 = arith.constant 0 : i32
    %c0_i32_1 = arith.constant 0 : i32
    return %c0_i32, %c0_i32_0 : i32, i32
  }
  func.func @transform_9(%arg0: i32) -> (i32, i32) {
    %c0_i32 = arith.constant 0 : i32
    %c0_i32_0 = arith.constant 0 : i32
    %c0_i32_1 = arith.constant 0 : i32
    return %c0_i32, %c0_i32_0 : i32, i32
  }
  func.func @transform_10(%arg0: i32) -> (i32, i32) {
    %c0_i32 = arith.constant 0 : i32
    %c0_i32_0 = arith.constant 0 : i32
    %c0_i32_1 = arith.constant 0 : i32
    return %c0_i32, %c0_i32_0 : i32, i32
  }
  func.func @transform_11(%arg0: i32) -> (i32, i32) {
    %c0_i32 = arith.constant 0 : i32
    %c0_i32_0 = arith.constant 0 : i32
    return %arg0, %c0_i32 : i32, i32
  }
}

</mosaic_0001>

<bundles_post_ra>
// kernel: tpu_custom_call.1
= control target key start
LH: loop header
LB: loop body
LE: loop exit
PB: predicated region body
PF: predicated region fallthrough
CT: control target
= control target key end

     0   :  { %16 = vsyncpa [#allocation3], 0  ;;  %s840_s0 = inlined_call_operand.vmem [shape: f32[10,16], index: 0, kind: input, shape index: {}]   ;;  %s841_s1 = inlined_call_operand.hbm [shape: f32[10,16], index: 1, kind: input, shape index: {}]   ;;  %s842_s2 = inlined_call_operand.vmem [shape: bf16[16,128], index: 2, kind: input, shape index: {}]   ;;  %s843_s3 = inlined_call_operand.hbm [shape: bf16[16,128], index: 3, kind: input, shape index: {}]   ;;  %s844_s4 = inlined_call_operand.vmem [shape: f32[1,128], index: 4, kind: input, shape index: {}]   ;;  %s845_s5 = inlined_call_operand.vmem [shape: f32[1,128], index: 5, kind: input, shape index: {}]   ;;  %s846_s6 = inlined_call_operand.vmem [shape: f32[1,128], index: 6, kind: input, shape index: {}]   ;;  %s847_s7 = inlined_call_operand.vmem [shape: bf16[128,128], index: 7, kind: input, shape index: {}]   ;;  %s848_s8 = inlined_call_operand.vmem [shape: f32[1,128], index: 8, kind: input, shape index: {}]   ;;  %s849_s9 = inlined_call_operand.vmem [shape: bf16[128,4], index: 9, kind: input, shape index: {}]   ;;  %s850_s10 = inlined_call_operand.vmem [shape: f32[1,4], index: 10, kind: input, shape index: {}]   ;;  %s851_s11 = inlined_call_operand.vmem [shape: f32[10,4], index: 11, kind: output, shape index: {}]  }
   0x1   :  { %17 = vsyncpa [#allocation5], 0  ;;  %s644_s17 = smov [#allocation2]   ;;  %s596_s21 = scalar_lea.hbm %s841_s1, 256 }
   0x2   :  { %s25_s18 = sshll.u32 %s644_s17, 4  ;;  %p597_p0 = scmp.ne.s32.totalorder %s841_s1, %s596_s21  ;;  %s26_s18 = int_to_ptr.vmem [resolvable:$true] %s25_s18 }
   0x3   :  { %p600_p1 = scmp.lt.u32.totalorder %s596_s21, %s841_s1 }
   0x5   :  { %p602_p2 = pnand %p600_p1, %p597_p0 }
   0x7   :  { %605 = shalt.err (!%p602_p2)
}
   0x8   :  { %s606_s26 = scalar_lea.vmem %s26_s18, 256  ;;  %p611_p4 = scmp.lt.s32.totalorder %s26_s18, %s26_s18 }
   0x9   :  { %p607_p3 = scmp.ne.s32.totalorder %s26_s18, %s606_s26  ;;  %p612_p5 = scmp.lt.s32.totalorder %s606_s26, %s606_s26 }
   0xb   :  { %p613_p6 = por %p612_p5, %p611_p4 }
   0xd   :  { %p614_p7 = pnand %p613_p6, %p607_p3 }
   0xf   :  { %617 = shalt.err (!%p614_p7)
}
  0x10   :  { %s645_s27 = smov 128   ;;  %s646_s28 = smov 8  }
  0x11   :  { %31 = dma.hbm_to_vmem [thread:$0]  %s841_s1, 256, %s26_s18, [#allocation3], %s645_s27, %s645_s27, %s646_s28  }
  0x12   :  { %s647_s12 = smov [#allocation4]   ;;  %s618_s16 = scalar_lea.hbm %s843_s3, 128 }
  0x13   :  { %s39_s13 = sshll.u32 %s647_s12, 4  ;;  %p619_p8 = scmp.ne.s32.totalorder %s843_s3, %s618_s16  ;;  %s40_s13 = int_to_ptr.vmem [resolvable:$true] %s39_s13 }
  0x14   :  { %p622_p9 = scmp.lt.u32.totalorder %s618_s16, %s843_s3 }
  0x16   :  { %p624_p10 = pnand %p622_p9, %p619_p8 }
  0x18   :  { %627 = shalt.err (!%p624_p10)
}
  0x19   :  { %s628_s22 = scalar_lea.vmem %s40_s13, 128  ;;  %p633_p12 = scmp.lt.s32.totalorder %s40_s13, %s40_s13 }
  0x1a   :  { %p629_p11 = scmp.ne.s32.totalorder %s40_s13, %s628_s22  ;;  %p634_p13 = scmp.lt.s32.totalorder %s628_s22, %s628_s22 }
  0x1c   :  { %p635_p0 = por %p634_p13, %p633_p12 }
  0x1e   :  { %p636_p1 = pnand %p635_p0, %p629_p11 }
  0x20   :  { %639 = shalt.err (!%p636_p1)
}
  0x21   :  { %s648_s1 = smov 64   ;;  %s649_s18 = smov 4  }
  0x22   :  { %45 = dma.hbm_to_vmem [thread:$0]  %s843_s3, 128, %s40_s13, [#allocation5], %s648_s1, %s648_s1, %s649_s18  }
  0x23   :  { %640 = dma.done.wait [#allocation3], 256  }
  0x24   :  { %641 = vsyncadd [#allocation3], 4294967040 }
  0x25   :  { %642 = dma.done.wait [#allocation5], 128  }
  0x26   :  { %643 = vsyncadd [#allocation5], 4294967168  ;;  %v650_v0 = vmov 0.0   ;;  %vm651_vm0 = vmmov 0   ;;  %v574_v1 = vld [vmem:[#allocation4] sm:$0xff]   ;;  %v575_v2 = vld [vmem:[%s842_s2] sm:$0xff]  }
  0x27   :  { %514 = vmatprep.subr.bf16.mxu0 %v650_v0  ;;  %520 = vmatprep.subr.bf16.mxu1 %v650_v0  ;;  %v72_v3 = vld [vmem:[#allocation2] sm:$0xff]  ;;  %v73_v4 = vld [vmem:[#allocation2 + $0x8] sm:$0xff]  ;;  %vm83_vm1 = vcmask 130048   ;;  %v578_v32 = vld [vmem:[%s847_s7 + $0x10] sm:$0xff]   ;;  %vm458_vm2 = vcmask 31744  }
  0x28   :  { %516 = vmatprep.mubr.msk.bf16.mxu0 %vm651_vm0, %v650_v0  ;;  %522 = vmatprep.mubr.msk.bf16.mxu1 %vm651_vm0, %v650_v0  ;;  %v67_v5 = vld [vmem:[%s840_s0] sm:$0xff]  ;;  %v74_v6 = vpack.c.bf16 %v73_v4, %v72_v3  ;;  %v68_v7 = vld [vmem:[%s840_s0 + $0x8] sm:$0xff]  ;;  %v579_v33 = vld [vmem:[%s847_s7 + $0x18] sm:$0xff]  }
  0x29   :  { %515 = vmatpush3.bf16.msra.mxu0 %v574_v1  ;;  %521 = vmatpush3.bf16.msra.mxu1 %v575_v2  ;;  %v69_v8 = vpack.c.bf16 %v68_v7, %v67_v5  ;;  %v471_v12 = vld [vmem:[%s844_s4] ss:$0 sm:$0xff]  ;;  %v577_v31 = vld [vmem:[%s847_s7 + $0x8] sm:$0xff]   ;;  %v582_v36 = vld [vmem:[%s847_s7 + $0x30] sm:$0xff]  }
  0x2a   :  { %526 = vmatprep.subr.bf16.mxu0 %v650_v0  ;;  %546 = vmatprep.subr.bf16.mxu1 %v650_v0  ;;  %v576_v22 = vld [vmem:[%s847_s7] sm:$0xff]   ;;  %v581_v35 = vld [vmem:[%s847_s7 + $0x28] sm:$0xff]   ;;  %v583_v37 = vld [vmem:[%s847_s7 + $0x38] sm:$0xff]  }
  0x2b   :  { %v580_v34 = vld [vmem:[%s847_s7 + $0x20] sm:$0xff]   ;;  %v585_v39 = vld [vmem:[%s849_s9 + $0x8] sm:$0xff]   ;;  %v586_v40 = vld [vmem:[%s849_s9 + $0x10] sm:$0xff]  }
  0x2c   :  { %517 = vmatmul.mubr.msk.bf16.vlgmr.msra.gmra.mrb[0].mxu0 %vm83_vm1, %v74_v6  ;;  %523 = vmatmul.mubr.msk.bf16.vlgmr.msra.gmra.mrb[0].mxu1 %vm83_vm1, %v69_v8  ;;  %v584_v38 = vld [vmem:[%s849_s9] sm:$0xff]   ;;  %v587_v41 = vld [vmem:[%s849_s9 + $0x18] sm:$0xff]   ;;  %v589_v43 = vld [vmem:[%s849_s9 + $0x28] sm:$0xff]  }
  0x2d   :  { %542 = vmatprep.mubr.msk.bf16.mxu0 %vm651_vm0, %v650_v0  ;;  %562 = vmatprep.mubr.msk.bf16.mxu1 %vm651_vm0, %v650_v0  ;;  %v588_v42 = vld [vmem:[%s849_s9 + $0x20] sm:$0xff]   ;;  %v590_v63 = vld [vmem:[%s849_s9 + $0x30] sm:$0xff]   ;;  %v591_v1 = vld [vmem:[%s849_s9 + $0x38] sm:$0xff]  }
  0x2e   :  { %527 = vmatpush3.bf16.msra.mxu0 %v576_v22  ;;  %547 = vmatpush3.bf16.msra.mxu1 %v584_v38  ;;  %v472_v50 = vld [vmem:[%s845_s5] ss:$0 sm:$0xff] }
  0x2f   :  { %528 = vmatprep.subr.bf16.mxu0 %v650_v0  ;;  %548 = vmatprep.subr.bf16.mxu1 %v650_v0  ;;  %v473_v55 = vld [vmem:[%s846_s6] ss:$0 sm:$0xff] }
  0x30   :  { %v474_v2 = vld [vmem:[%s848_s8] ss:$0 sm:$0xff] }
  0x32   :  { %529 = vmatpush3.bf16.msra.mxu0 %v577_v31  ;;  %549 = vmatpush3.bf16.msra.mxu1 %v585_v39 }
  0x33   :  { %530 = vmatprep.subr.bf16.mxu0 %v650_v0  ;;  %550 = vmatprep.subr.bf16.mxu1 %v650_v0 }
  0x36   :  { %531 = vmatpush3.bf16.msra.mxu0 %v578_v32  ;;  %551 = vmatpush3.bf16.msra.mxu1 %v586_v40 }
  0x37   :  { %532 = vmatprep.subr.bf16.mxu0 %v650_v0  ;;  %552 = vmatprep.subr.bf16.mxu1 %v650_v0 }
  0x3a   :  { %533 = vmatpush3.bf16.msra.mxu0 %v579_v33  ;;  %553 = vmatpush3.bf16.msra.mxu1 %v587_v41 }
  0x3b   :  { %534 = vmatprep.subr.bf16.mxu0 %v650_v0  ;;  %554 = vmatprep.subr.bf16.mxu1 %v650_v0 }
  0x3e   :  { %535 = vmatpush3.bf16.msra.mxu0 %v580_v34  ;;  %555 = vmatpush3.bf16.msra.mxu1 %v588_v42 }
  0x3f   :  { %536 = vmatprep.subr.bf16.mxu0 %v650_v0  ;;  %556 = vmatprep.subr.bf16.mxu1 %v650_v0 }
  0x42   :  { %537 = vmatpush3.bf16.msra.mxu0 %v581_v35  ;;  %557 = vmatpush3.bf16.msra.mxu1 %v589_v43 }
  0x43   :  { %538 = vmatprep.subr.bf16.mxu0 %v650_v0  ;;  %558 = vmatprep.subr.bf16.mxu1 %v650_v0 }
  0x46   :  { %539 = vmatpush3.bf16.msra.mxu0 %v582_v36  ;;  %559 = vmatpush3.bf16.msra.mxu1 %v590_v63 }
  0x47   :  { %540 = vmatprep.subr.bf16.mxu0 %v650_v0  ;;  %560 = vmatprep.subr.bf16.mxu1 %v650_v0  ;;  %v483_v0 = vld [vmem:[%s850_s10] ss:$0 sm:$0xff] }
  0x4a   :  { %541 = vmatpush3.bf16.msra.mxu0 %v583_v37  ;;  %561 = vmatpush3.bf16.msra.mxu1 %v591_v1 }
  0xff   :  { %v121_v9 = vpop.f32.mrb[0].mxu0  ;;  %v171_v10 = vpop.f32.mrb[0].mxu1 }
 0x100   :  { %v518_v11 = vpop.f32.mrb[1].mxu0  ;;  %v172_v13 = vadd.f32 %v171_v10, %v121_v9  ;;  %v524_v14 = vpop.f32.mrb[1].mxu1 }
 0x101   :  { %v124_v15 = vpop.f32.mrb[2].mxu0  ;;  %v174_v16 = vpop.f32.mrb[2].mxu1 }
 0x102   :  { %v519_v17 = vpop.f32.mrb[3].mxu0  ;;  %v175_v18 = vadd.f32 %v174_v16, %v124_v15  ;;  %v525_v19 = vpop.f32.mrb[3].mxu1  ;;  %v185_v20 = vadd.f32 %v471_v12, %v172_v13 }
 0x104   :  { %187 = vadd.xlane.f32.xlu0 %v185_v20  ;;  %v186_v21 = vadd.f32 %v471_v12, %v175_v18 }
 0x108   :  { %189 = vadd.xlane.f32.xlu0 %v186_v21 }
 0x191   :  { %v188_v23 = vpop.xlane.xlu0 %187 }
 0x192   :  { %v192_v24 = vmul.f32 0.0078125, %v188_v23 }
 0x194   :  { %v194_v25 = vsub.f32 %v185_v20, %v192_v24 }
 0x195   :  { %v190_v26 = vpop.xlane.xlu0 %189 }
 0x196   :  { %v193_v27 = vmul.f32 0.0078125, %v190_v26  ;;  %v196_v28 = vmul.f32 %v194_v25, %v194_v25 }
 0x198   :  { %v195_v29 = vsub.f32 %v186_v21, %v193_v27  ;;  %198 = vadd.xlane.f32.xlu1 %v196_v28 }
 0x19a   :  { %v197_v30 = vmul.f32 %v195_v29, %v195_v29 }
 0x19c   :  { %200 = vadd.xlane.f32.xlu1 %v197_v30 }
 0x225   :  { %v199_v44 = vpop.xlane.xlu1 %198 }
 0x226   :  { %v202_v45 = vmul.f32 0.0078125, %v199_v44 }
 0x228   :  { %v205_v46 = vadd.f32 1e-05, %v202_v45 }
 0x229   :  { %v201_v47 = vpop.xlane.xlu1 %200 }
 0x22a   :  { %592 = vrsqrt.f32 %v205_v46  ;;  %v203_v48 = vmul.f32 0.0078125, %v201_v47 }
 0x22c   :  { %v206_v49 = vadd.f32 1e-05, %v203_v48 }
 0x22e   :  { %594 = vrsqrt.f32 %v206_v49 }
 0x234   :  { %v593_v51 = vpop.eup %592 }
 0x235   :  { %v215_v52 = vmul.f32 %v593_v51, %v472_v50 }
 0x237   :  { %v217_v53 = vmul.f32 %v215_v52, %v194_v25 }
 0x238   :  { %v595_v54 = vpop.eup %594 }
 0x239   :  { %v216_v56 = vmul.f32 %v595_v54, %v472_v50  ;;  %v226_v58 = vadd.f32 %v473_v55, %v217_v53 }
 0x23b   :  { %v218_v57 = vmul.f32 %v216_v56, %v195_v29  ;;  %v228_v60 = vmax.f32 %v226_v58, 0.0 }
 0x23d   :  { %v227_v59 = vadd.f32 %v473_v55, %v218_v57 }
 0x23f   :  { %v229_v61 = vmax.f32 %v227_v59, 0.0 }
 0x241   :  { %v230_v62 = vpack.c.bf16 %v229_v61, %v228_v60 }
 0x243   :  { %543 = vmatmul.mubr.bf16.vlgmr.msra.gmra.mrb[4].mxu0 %v230_v62 }
 0x316   :  { %v336_v3 = vpop.f32.mrb[4].mxu0 }
 0x317   :  { %v337_v4 = vadd.f32 %v474_v2, %v336_v3  ;;  %v544_v5 = vpop.f32.mrb[5].mxu0 }
 0x318   :  { %v339_v6 = vpop.f32.mrb[6].mxu0 }
 0x319   :  { %v340_v7 = vadd.f32 %v474_v2, %v339_v6  ;;  %v545_v8 = vpop.f32.mrb[7].mxu0  ;;  %v343_v9 = vmax.f32 %v337_v4, 0.0 }
 0x31b   :  { %v344_v10 = vmax.f32 %v340_v7, 0.0 }
 0x31d   :  { %v345_v11 = vpack.c.bf16 %v344_v10, %v343_v9 }
 0x31f   :  { %563 = vmatmul.mubr.bf16.vlgmr.msra.gmra.mrb[4].mxu1 %v345_v11 }
 0x3f2   :  { %v451_v12 = vpop.f32.mrb[4].mxu1 }
 0x3f3   :  { %v452_v13 = vadd.f32 %v483_v0, %v451_v12  ;;  %v564_v14 = vpop.f32.mrb[5].mxu1 }
 0x3f4   :  { %v454_v15 = vpop.f32.mrb[6].mxu1 }
 0x3f5   :  { %459 = vst.msk [vmem:[%s851_s11] sm:$0xff] %vm458_vm2, %v452_v13  ;;  %v455_v16 = vadd.f32 %v483_v0, %v454_v15  ;;  %v565_v17 = vpop.f32.mrb[7].mxu1 }
 0x3f7   :  { %460 = vst.msk [vmem:[%s851_s11 + $0x8] sm:$0xff] %vm458_vm2, %v455_v16 }
 0x3f8   :  { %465 = vsyncpa [#allocation3], 1 }
 0x3f9   :  { %466 = vsyncpa [#allocation5], 1 }

</bundles_post_ra>
